<compile_context>
chip_gen: v7x
topology: tpu7x:2x2x1
jax: 0.10.0
libtpu: 0.0.40
codegen_flags: <defaults>
</compile_context>

<pallas_src>
import functools

import jax
import jax.numpy as jnp
from jax.experimental import pallas as pl
from jax.experimental.pallas import tpu as pltpu


def _round_up(x, m):
    return (x + m - 1) // m * m


def _pick_tile(n, target, align):
    """Largest tile <= target that is a multiple of `align` and divides n, else full n."""
    if n <= target:
        return n
    t = (target // align) * align
    while t >= align:
        if n % t == 0:
            return t
        t -= align
    return n


# ----------------------------------------------------------------------------
# Kernel 1: tiled fused linear (x @ W + b) -- qkv projection and output proj.
# ----------------------------------------------------------------------------
def _linear_kernel(x_ref, w_ref, b_ref, o_ref, acc_ref):
    k = pl.program_id(2)

    @pl.when(k == 0)
    def _():
        acc_ref[...] = jnp.zeros_like(acc_ref)

    acc_ref[...] += jnp.dot(
        x_ref[...].astype(jnp.bfloat16),
        w_ref[...].astype(jnp.bfloat16),
        preferred_element_type=jnp.float32,
    )

    @pl.when(k == pl.num_programs(2) - 1)
    def _():
        o_ref[...] = (acc_ref[...] + b_ref[...].astype(jnp.float32)).astype(o_ref.dtype)


def linear(x2d, w, b, *, tm=256, tn=256, tk=256):
    M, K = x2d.shape
    N = w.shape[1]
    tm = min(tm, _round_up(M, 8))          # multiple of 8 (or full M rounded up)
    tk = K if K <= tk else tk              # full K, or 256 (multiple of 128)
    tn = N if N <= tn else tn              # full N, or 256 (multiple of 128)
    Mp, Kp, Np = _round_up(M, tm), _round_up(K, tk), _round_up(N, tn)

    xp = x2d if (Mp == M and Kp == K) else jnp.pad(x2d, ((0, Mp - M), (0, Kp - K)))
    wp = w if (Kp == K and Np == N) else jnp.pad(w, ((0, Kp - K), (0, Np - N)))
    bp = b if Np == N else jnp.pad(b, (0, Np - N))

    out = pl.pallas_call(
        _linear_kernel,
        out_shape=jax.ShapeDtypeStruct((Mp, Np), x2d.dtype),
        grid=(Mp // tm, Np // tn, Kp // tk),
        in_specs=[
            pl.BlockSpec((tm, tk), lambda i, j, k: (i, k)),
            pl.BlockSpec((tk, tn), lambda i, j, k: (k, j)),
            pl.BlockSpec((1, tn), lambda i, j, k: (0, j)),
        ],
        out_specs=pl.BlockSpec((tm, tn), lambda i, j, k: (i, j)),
        scratch_shapes=[pltpu.VMEM((tm, tn), jnp.float32)],
        compiler_params=pltpu.CompilerParams(
            dimension_semantics=("parallel", "parallel", "arbitrary")),
    )(xp, wp, bp.reshape(1, Np))
    if Mp != M or Np != N:
        out = out[:M, :N]
    return out


# ----------------------------------------------------------------------------
# Kernel 2: depthwise 3x3 conv (stride 1, pad 1, no bias) + per-head LayerNorm,
#           all heads folded into the (lane-dense) channel dim C = num_heads*hd.
# ----------------------------------------------------------------------------
def _pool_norm_kernel(x_ref, w_ref, avg_ref, g_ref, b_ref, o_ref, *, H, W, C, eps=1e-5):
    x = x_ref[0].astype(jnp.float32)                       # (H, W, C)
    # In-VMEM halo (no HBM jnp.pad in the wrapper).
    zcol = jnp.zeros((H, 1, C), jnp.float32)
    zrow = jnp.zeros((1, W + 2, C), jnp.float32)
    xp = jnp.concatenate([zcol, x, zcol], axis=1)          # (H,   W+2, C)
    xp = jnp.concatenate([zrow, xp, zrow], axis=0)         # (H+2, W+2, C)

    acc = jnp.zeros((H, W, C), jnp.float32)
    for dy in range(3):                                    # static 3x3 taps
        for dx in range(3):
            tap = w_ref[dy, dx, :].astype(jnp.float32)     # (C,) head-tiled taps
            acc = acc + xp[dy:dy + H, dx:dx + W, :] * tap

    # Per-head LayerNorm over the hd channels of each head, kept lane-dense via
    # a block-diagonal averaging matmul (no lane-splitting reshape).
    flat = acc.reshape(H * W, C)
    mean = jnp.dot(flat, avg_ref[...], preferred_element_type=jnp.float32)
    cent = flat - mean
    var = jnp.dot(cent * cent, avg_ref[...], preferred_element_type=jnp.float32)
    y = cent * jax.lax.rsqrt(var + eps)
    y = y * g_ref[...].astype(jnp.float32) + b_ref[...].astype(jnp.float32)
    o_ref[0] = y.reshape(H, W, C).astype(o_ref.dtype)


def pool_norm(x, w_tiled, avg, gamma_tiled, beta_tiled):
    # x: (B, H, W, C) with heads folded into C; w_tiled: (3,3,C); avg: (C,C).
    B, H, W, C = x.shape
    kern = functools.partial(_pool_norm_kernel, H=H, W=W, C=C)
    return pl.pallas_call(
        kern,
        out_shape=jax.ShapeDtypeStruct((B, H, W, C), x.dtype),
        grid=(B,),
        in_specs=[
            pl.BlockSpec((1, H, W, C), lambda b: (b, 0, 0, 0)),
            pl.BlockSpec((3, 3, C), lambda b: (0, 0, 0)),
            pl.BlockSpec((C, C), lambda b: (0, 0)),
            pl.BlockSpec((1, C), lambda b: (0, 0)),
            pl.BlockSpec((1, C), lambda b: (0, 0)),
        ],
        out_specs=pl.BlockSpec((1, H, W, C), lambda b: (b, 0, 0, 0)),
        compiler_params=pltpu.CompilerParams(dimension_semantics=("parallel",)),
    )(x, w_tiled, avg, gamma_tiled.reshape(1, C), beta_tiled.reshape(1, C))


# ----------------------------------------------------------------------------
# Kernel 3: flash-style attention over G heads per grid step, with residual
#           pooling fused into the finalize (out = softmax(q*scale @ k^T) @ v + q).
# ----------------------------------------------------------------------------
def _attn_kernel(q_ref, k_ref, v_ref, o_ref, m_sc, l_sc, acc_sc, *, scale):
    kv = pl.program_id(2)

    @pl.when(kv == 0)
    def _():
        m_sc[...] = jnp.full_like(m_sc, -jnp.inf)
        l_sc[...] = jnp.zeros_like(l_sc)
        acc_sc[...] = jnp.zeros_like(acc_sc)

    q = (q_ref[0].astype(jnp.float32) * scale).astype(jnp.bfloat16)   # (G, tq, hd)
    k = k_ref[0].astype(jnp.bfloat16)                                 # (G, tk, hd)
    s = jnp.einsum("gqd,gkd->gqk", q, k, preferred_element_type=jnp.float32)

    m_new = jnp.maximum(m_sc[...], s.max(axis=-1, keepdims=True))
    alpha = jnp.exp(m_sc[...] - m_new)
    p = jnp.exp(s - m_new)
    l_sc[...] = alpha * l_sc[...] + p.sum(axis=-1, keepdims=True)
    pv = jnp.einsum("gqk,gkd->gqd", p.astype(jnp.bfloat16),
                    v_ref[0].astype(jnp.bfloat16),
                    preferred_element_type=jnp.float32)
    acc_sc[...] = alpha * acc_sc[...] + pv
    m_sc[...] = m_new

    @pl.when(kv == pl.num_programs(2) - 1)
    def _():
        inv_l = pl.reciprocal(l_sc[...], approx=True)
        o_ref[0] = (acc_sc[...] * inv_l + q_ref[0].astype(jnp.float32)).astype(o_ref.dtype)


def attention(q, k, v, scale):
    # q/k/v: (num_groups, G, N, hd)
    ng, G, N, hd = q.shape
    tq = _pick_tile(N, 128, 8)
    tkv = _pick_tile(N, 512, 8)
    kern = functools.partial(_attn_kernel, scale=scale)
    return pl.pallas_call(
        kern,
        out_shape=jax.ShapeDtypeStruct((ng, G, N, hd), q.dtype),
        grid=(ng, N // tq, N // tkv),
        in_specs=[
            pl.BlockSpec((1, G, tq, hd), lambda g, qi, ki: (g, 0, qi, 0)),
            pl.BlockSpec((1, G, tkv, hd), lambda g, qi, ki: (g, 0, ki, 0)),
            pl.BlockSpec((1, G, tkv, hd), lambda g, qi, ki: (g, 0, ki, 0)),
        ],
        out_specs=pl.BlockSpec((1, G, tq, hd), lambda g, qi, ki: (g, 0, qi, 0)),
        scratch_shapes=[
            pltpu.VMEM((G, tq, 1), jnp.float32),
            pltpu.VMEM((G, tq, 1), jnp.float32),
            pltpu.VMEM((G, tq, hd), jnp.float32),
        ],
        compiler_params=pltpu.CompilerParams(
            dimension_semantics=("parallel", "parallel", "arbitrary")),
    )(q, k, v)


def _pick_head_group(bh, hd):
    """Largest divisor of B*num_heads with G*hd reasonably large (MXU/lane fill)."""
    target = max(1, 256 // max(hd, 1))
    g = 1
    for cand in range(1, min(bh, target) + 1):
        if bh % cand == 0:
            g = cand
    return g


# ----------------------------------------------------------------------------
# Full forward pass.
# ----------------------------------------------------------------------------
def multiscale_attention_forward(x, params, num_heads):
    B, H, W, dim = x.shape
    dim_out = params["proj_b"].shape[0]
    hd = dim_out // num_heads
    scale = hd ** (-0.5)
    N = H * W

    # Fused qkv projection: one tiled linear over all 3*dim_out output columns
    # (x read from HBM once).  Column order matches PyTorch's
    # reshape(B,H,W,3,num_heads,hd), so each dim_out slice is already in the
    # head-folded layout pool_norm consumes (no head-split slice/transpose).
    x2d = x.reshape(B * N, dim)
    qkv = linear(x2d, params["qkv_w"], params["qkv_b"])              # (B*N, 3*dim_out)
    q_lin = qkv[:, 0 * dim_out:1 * dim_out]
    k_lin = qkv[:, 1 * dim_out:2 * dim_out]
    v_lin = qkv[:, 2 * dim_out:3 * dim_out]

    # Block-diagonal per-head averaging matrix for the segmented LayerNorm.
    avg = jnp.kron(jnp.eye(num_heads, dtype=jnp.float32),
                   jnp.full((hd, hd), 1.0 / hd, jnp.float32))        # (dim_out, dim_out)

    def pn(t2d, wk, gk, bk):
        return pool_norm(t2d.reshape(B, H, W, dim_out),
                         jnp.tile(params[wk], (1, 1, num_heads)), avg,
                         jnp.tile(params[gk], (num_heads,)),
                         jnp.tile(params[bk], (num_heads,)))

    q = pn(q_lin, "pool_q_w", "norm_q_g", "norm_q_b")
    k = pn(k_lin, "pool_k_w", "norm_k_g", "norm_k_b")
    v = pn(v_lin, "pool_v_w", "norm_v_g", "norm_v_b")

    # Group heads so each attention grid step processes G heads at once.
    BH = B * num_heads
    G = _pick_head_group(BH, hd)

    # TODO(synk): fold these head split/merge transposes into the attention
    # BlockSpecs (needs an in-kernel (tq, G*hd) <-> (G, tq, hd) relayout).
    def to_heads(t):
        return (t.reshape(B, N, num_heads, hd).transpose(0, 2, 1, 3)
                 .reshape(BH // G, G, N, hd))

    xo = attention(to_heads(q), to_heads(k), to_heads(v), scale)     # (ng, G, N, hd)
    xo = (xo.reshape(B, num_heads, N, hd).transpose(0, 2, 1, 3)
            .reshape(B * N, dim_out))

    out = linear(xo, params["proj_w"], params["proj_b"])
    return out.reshape(B, H, W, dim_out)


# ----------------------------------------------------------------------------
# Pure-JAX f32 reference (same math) used for a sanity check.
# ----------------------------------------------------------------------------
def reference_forward(x, p, num_heads):
    B, H, W, dim = x.shape
    dim_out = p["proj_b"].shape[0]
    hd = dim_out // num_heads
    scale = hd ** (-0.5)

    qkv = x.reshape(B * H * W, dim) @ p["qkv_w"] + p["qkv_b"]
    qkv = qkv.reshape(B, H, W, 3, num_heads, hd).transpose(3, 0, 4, 1, 2, 5)
    qkv = qkv.reshape(3, B * num_heads, H, W, hd)

    def pool_norm_ref(t, w, g, b):
        tp = jnp.pad(t, ((0, 0), (1, 1), (1, 1), (0, 0)))
        acc = jnp.zeros_like(t)
        for dy in range(3):
            for dx in range(3):
                acc = acc + tp[:, dy:dy + H, dx:dx + W, :] * w[dy, dx, :]
        mean = jnp.mean(acc, axis=-1, keepdims=True)
        var = jnp.mean((acc - mean) ** 2, axis=-1, keepdims=True)
        return (acc - mean) / jnp.sqrt(var + 1e-5) * g + b

    q = pool_norm_ref(qkv[0], p["pool_q_w"], p["norm_q_g"], p["norm_q_b"])
    k = pool_norm_ref(qkv[1], p["pool_k_w"], p["norm_k_g"], p["norm_k_b"])
    v = pool_norm_ref(qkv[2], p["pool_v_w"], p["norm_v_g"], p["norm_v_b"])

    BH, N = B * num_heads, H * W
    qf, kf, vf = (t.reshape(BH, N, hd) for t in (q, k, v))
    attn = jax.nn.softmax((qf * scale) @ jnp.swapaxes(kf, -2, -1), axis=-1)
    xo = attn @ vf + qf
    xo = xo.reshape(B, num_heads, H, W, hd).transpose(0, 2, 3, 1, 4).reshape(B, H, W, dim_out)
    return (xo.reshape(B * H * W, dim_out) @ p["proj_w"] + p["proj_b"]).reshape(B, H, W, dim_out)


def init_params(key, dim, dim_out, num_heads):
    hd = dim_out // num_heads
    ks = jax.random.split(key, 8)
    return {
        "qkv_w": 0.02 * jax.random.normal(ks[0], (dim, 3 * dim_out), jnp.float32),
        "qkv_b": 0.01 * jax.random.normal(ks[1], (3 * dim_out,), jnp.float32),
        "pool_q_w": 0.1 * jax.random.normal(ks[2], (3, 3, hd), jnp.float32),
        "pool_k_w": 0.1 * jax.random.normal(ks[3], (3, 3, hd), jnp.float32),
        "pool_v_w": 0.1 * jax.random.normal(ks[4], (3, 3, hd), jnp.float32),
        "norm_q_g": jnp.ones((hd,), jnp.float32),
        "norm_q_b": jnp.zeros((hd,), jnp.float32),
        "norm_k_g": jnp.ones((hd,), jnp.float32),
        "norm_k_b": jnp.zeros((hd,), jnp.float32),
        "norm_v_g": jnp.ones((hd,), jnp.float32),
        "norm_v_b": jnp.zeros((hd,), jnp.float32),
        "proj_w": 0.02 * jax.random.normal(ks[5], (dim_out, dim_out), jnp.float32),
        "proj_b": 0.01 * jax.random.normal(ks[6], (dim_out,), jnp.float32),
    }


if __name__ == "__main__":
    # Small deterministic config: dim=dim_out=32, num_heads=4 (head_dim=8), 8x8 spatial.
    B, H, W, dim = 2, 8, 8, 32
    dim_out, num_heads = 32, 4

    key = jax.random.PRNGKey(0)
    kx, kp = jax.random.split(key)
    x = jax.random.normal(kx, (B, H, W, dim), jnp.float32)
    params = init_params(kp, dim, dim_out, num_heads)

    out = multiscale_attention_forward(x, params, num_heads)
    out = jax.block_until_ready(out)

    ref = reference_forward(x, params, num_heads)
    assert out.shape == (B, H, W, dim_out)
    assert jnp.allclose(out, ref, rtol=2e-2, atol=2e-2), "mismatch vs reference"

    print("KERNEL_OK")
</pallas_src>

<mosaic_0001>
module attributes {stable_mosaic.version = 11 : i64} {
  func.func @_linear_kernel(%arg0: i32, %arg1: i32, %arg2: i32, %arg3: memref<128x32xf32, #tpu.memory_space<vmem>>, %arg4: memref<32x96xf32, #tpu.memory_space<vmem>>, %arg5: memref<1x96xf32, #tpu.memory_space<vmem>>, %arg6: memref<128x96xf32, #tpu.memory_space<vmem>>, %arg7: memref<128x96xf32, #tpu.memory_space<vmem>>) attributes {dimension_semantics = [#tpu.dimension_semantics<parallel>, #tpu.dimension_semantics<parallel>, #tpu.dimension_semantics<arbitrary>], iteration_bounds = array<i64: 1, 1, 1>, scalar_prefetch = 0 : i64, scratch_operands = 1 : i64, tpu.core_type = #tpu.core_type<tc>, window_params = [{transform_indices = @transform_0, window_bounds = array<i64: 128, 32>}, {transform_indices = @transform_1, window_bounds = array<i64: 32, 96>}, {transform_indices = @transform_2, window_bounds = array<i64: 1, 96>}, {transform_indices = @transform_3, window_bounds = array<i64: 128, 96>}]} {
    %c0_i32 = arith.constant 0 : i32
    %0 = arith.cmpi eq, %arg2, %c0_i32 : i32
    %1 = arith.extui %0 : i1 to i32
    %c0_i32_0 = arith.constant 0 : i32
    %2 = arith.cmpi ne, %1, %c0_i32_0 : i32
    scf.if %2 {
      %cst_10 = arith.constant 0.000000e+00 : f32
      %14 = vector.broadcast %cst_10 : f32 to vector<128x96xf32>
      %c0_11 = arith.constant 0 : index
      %c0_12 = arith.constant 0 : index
      %15 = vector.load %arg7[%c0_11, %c0_12] : memref<128x96xf32, #tpu.memory_space<vmem>>, vector<128x96xf32>
      tpu.vector_store %arg7[%c0_11, %c0_12], %14 {strides = array<i32>} : memref<128x96xf32, #tpu.memory_space<vmem>>, vector<128x96xf32>,
    } else {
    }
    %c0 = arith.constant 0 : index
    %c0_1 = arith.constant 0 : index
    %3 = vector.load %arg7[%c0, %c0_1] : memref<128x96xf32, #tpu.memory_space<vmem>>, vector<128x96xf32>
    %c0_2 = arith.constant 0 : index
    %c0_3 = arith.constant 0 : index
    %4 = vector.load %arg3[%c0_2, %c0_3] : memref<128x32xf32, #tpu.memory_space<vmem>>, vector<128x32xf32>
    %5 = arith.truncf %4 : vector<128x32xf32> to vector<128x32xbf16>
    %c0_4 = arith.constant 0 : index
    %c0_5 = arith.constant 0 : index
    %6 = vector.load %arg4[%c0_4, %c0_5] : memref<32x96xf32, #tpu.memory_space<vmem>>, vector<32x96xf32>
    %7 = arith.truncf %6 : vector<32x96xf32> to vector<32x96xbf16>
    %cst = arith.constant dense<0.000000e+00> : vector<128x96xf32>
    %8 = tpu.matmul %5, %7, %cst {dimension_numbers = #tpu.dot_dimension_numbers<[1], [0], [0], [1], [0, 0, 1, 1], [], []>} : vector<128x32xbf16>, vector<32x96xbf16>, vector<128x96xf32> -> vector<128x96xf32>
    %9 = arith.addf %3, %8 : vector<128x96xf32>
    %c0_6 = arith.constant 0 : index
    %c0_7 = arith.constant 0 : index
    %10 = vector.load %arg7[%c0_6, %c0_7] : memref<128x96xf32, #tpu.memory_space<vmem>>, vector<128x96xf32>
    tpu.vector_store %arg7[%c0_6, %c0_7], %9 {strides = array<i32>} : memref<128x96xf32, #tpu.memory_space<vmem>>, vector<128x96xf32>,
    %c0_i32_8 = arith.constant 0 : i32
    %11 = arith.cmpi eq, %arg2, %c0_i32_8 : i32
    %12 = arith.extui %11 : i1 to i32
    %c0_i32_9 = arith.constant 0 : i32
    %13 = arith.cmpi ne, %12, %c0_i32_9 : i32
    scf.if %13 {
      %c0_10 = arith.constant 0 : index
      %c0_11 = arith.constant 0 : index
      %14 = vector.load %arg7[%c0_10, %c0_11] : memref<128x96xf32, #tpu.memory_space<vmem>>, vector<128x96xf32>
      %c0_12 = arith.constant 0 : index
      %c0_13 = arith.constant 0 : index
      %15 = vector.load %arg5[%c0_12, %c0_13] : memref<1x96xf32, #tpu.memory_space<vmem>>, vector<1x96xf32>
      %16 = vector.broadcast %15 : vector<1x96xf32> to vector<128x96xf32>
      %17 = arith.addf %14, %16 : vector<128x96xf32>
      %c0_14 = arith.constant 0 : index
      %c0_15 = arith.constant 0 : index
      %18 = vector.load %arg6[%c0_14, %c0_15] : memref<128x96xf32, #tpu.memory_space<vmem>>, vector<128x96xf32>
      tpu.vector_store %arg6[%c0_14, %c0_15], %17 {strides = array<i32>} : memref<128x96xf32, #tpu.memory_space<vmem>>, vector<128x96xf32>,
    } else {
    }
    return
  }
  func.func @transform_0(%arg0: i32, %arg1: i32, %arg2: i32) -> (i32, i32) {
    %c0_i32 = arith.constant 0 : i32
    return %arg0, %arg2 : i32, i32
  }
  func.func @transform_1(%arg0: i32, %arg1: i32, %arg2: i32) -> (i32, i32) {
    %c0_i32 = arith.constant 0 : i32
    return %arg2, %arg1 : i32, i32
  }
  func.func @transform_2(%arg0: i32, %arg1: i32, %arg2: i32) -> (i32, i32) {
    %c0_i32 = arith.constant 0 : i32
    %c0_i32_0 = arith.constant 0 : i32
    return %c0_i32, %arg1 : i32, i32
  }
  func.func @transform_3(%arg0: i32, %arg1: i32, %arg2: i32) -> (i32, i32) {
    %c0_i32 = arith.constant 0 : i32
    return %arg0, %arg1 : i32, i32
  }
}

</mosaic_0001>

<bundles_post_ra>
// kernel: tpu_custom_call.1
= control target key start
LH: loop header
LB: loop body
LE: loop exit
PB: predicated region body
PF: predicated region fallthrough
CT: control target
= control target key end

     0   :  { %vm19_vm0 = vcmask 785408   ;;  %v343_v3 = vmov 0.0   ;;  %vm82_vm1 = vcmask 261120   ;;  %s549_s1 = inlined_call_operand.vmem [shape: f32[32,96], index: 1, kind: input, shape index: {}]   ;;  %s550_s0 = inlined_call_operand.vmem [shape: f32[128,32], index: 0, kind: input, shape index: {}]   ;;  %s551_s2 = inlined_call_operand.vmem [shape: f32[1,96], index: 2, kind: input, shape index: {}]   ;;  %s552_s3 = inlined_call_operand.vmem [shape: f32[128,96], index: 3, kind: output, shape index: {}]  }
   0x1   :  { %v76_v0 = vld [vmem:[%s549_s1] sm:$0xff]  ;;  %v77_v1 = vld [vmem:[%s549_s1 + $0x8] sm:$0xff]  ;;  %v78_v2 = vld [vmem:[%s549_s1 + $0x10] sm:$0xff]  ;;  %22 = vst.msk [vmem:[#allocation2 + $0x10] sm:$0xff] %vm19_vm0, %v343_v3 }
   0x2   :  { %20 = vst.msk [vmem:[#allocation2] sm:$0xff] %vm19_vm0, %v343_v3  ;;  %21 = vst.msk [vmem:[#allocation2 + $0x8] sm:$0xff] %vm19_vm0, %v343_v3  ;;  %v80_v4 = vpack.c.bf16 %v77_v1, %v76_v0  ;;  %v79_v5 = vld [vmem:[%s549_s1 + $0x18] sm:$0xff]  ;;  %v52_v6 = vld [vmem:[%s550_s0] sm:$0xff] }
   0x3   :  { %23 = vst.msk [vmem:[#allocation2 + $0x18] sm:$0xff] %vm19_vm0, %v343_v3  ;;  %24 = vst.msk [vmem:[#allocation2 + $0x20] sm:$0xff] %vm19_vm0, %v343_v3  ;;  %v53_v7 = vld [vmem:[%s550_s0 + $0x8] sm:$0xff]  ;;  %v81_v8 = vpack.c.bf16 %v79_v5, %v78_v2  ;;  %v60_v10 = vld [vmem:[%s550_s0 + $0x40] sm:$0xff] }
   0x4   :  { %25 = vst.msk [vmem:[#allocation2 + $0x28] sm:$0xff] %vm19_vm0, %v343_v3  ;;  %26 = vst.msk [vmem:[#allocation2 + $0x30] sm:$0xff] %vm19_vm0, %v343_v3  ;;  %v68_v9 = vpack.c.bf16 %v53_v7, %v52_v6  ;;  %v61_v11 = vld [vmem:[%s550_s0 + $0x48] sm:$0xff]  ;;  %318 = vmatprep.subr.bf16.mxu0 %v80_v4  ;;  %338 = vmatprep.subr.bf16.mxu1 %v80_v4  ;;  %v54_v13 = vld [vmem:[%s550_s0 + $0x10] sm:$0xff] }
   0x5   :  { %27 = vst.msk [vmem:[#allocation2 + $0x38] sm:$0xff] %vm19_vm0, %v343_v3  ;;  %28 = vst.msk [vmem:[#allocation2 + $0x40] sm:$0xff] %vm19_vm0, %v343_v3  ;;  %v72_v12 = vpack.c.bf16 %v61_v11, %v60_v10  ;;  %v55_v14 = vld [vmem:[%s550_s0 + $0x18] sm:$0xff]  ;;  %319 = vmatpush3.bf16.msra.mxu0 %v80_v4  ;;  %340 = vmatpush3.bf16.msra.mxu1 %v80_v4  ;;  %v62_v15 = vld [vmem:[%s550_s0 + $0x50] sm:$0xff] }
   0x6   :  { %29 = vst.msk [vmem:[#allocation2 + $0x48] sm:$0xff] %vm19_vm0, %v343_v3  ;;  %30 = vst.msk [vmem:[#allocation2 + $0x50] sm:$0xff] %vm19_vm0, %v343_v3  ;;  %v63_v16 = vld [vmem:[%s550_s0 + $0x58] sm:$0xff]  ;;  %v56_v17 = vld [vmem:[%s550_s0 + $0x20] sm:$0xff]  ;;  %320 = vmatprep.subr.bf16.mxu0 %v81_v8  ;;  %339 = vmatprep.subr.bf16.mxu1 %v81_v8  ;;  %v69_v21 = vpack.c.bf16 %v55_v14, %v54_v13 }
   0x7   :  { %31 = vst.msk [vmem:[#allocation2 + $0x58] sm:$0xff] %vm19_vm0, %v343_v3  ;;  %32 = vst.msk [vmem:[#allocation2 + $0x60] sm:$0xff] %vm19_vm0, %v343_v3  ;;  %v57_v18 = vld [vmem:[%s550_s0 + $0x28] sm:$0xff]  ;;  %v64_v19 = vld [vmem:[%s550_s0 + $0x60] sm:$0xff]  ;;  %322 = vmatprep.mubr.msk.bf16.mxu0 %vm82_vm1, %v68_v9  ;;  %330 = vmatprep.mubr.msk.bf16.mxu1 %vm82_vm1, %v72_v12  ;;  %v73_v22 = vpack.c.bf16 %v63_v16, %v62_v15 }
   0x8   :  { %33 = vst.msk [vmem:[#allocation2 + $0x68] sm:$0xff] %vm19_vm0, %v343_v3  ;;  %34 = vst.msk [vmem:[#allocation2 + $0x70] sm:$0xff] %vm19_vm0, %v343_v3  ;;  %v65_v20 = vld [vmem:[%s550_s0 + $0x68] sm:$0xff]  ;;  %v70_v23 = vpack.c.bf16 %v57_v18, %v56_v17  ;;  %v58_v25 = vld [vmem:[%s550_s0 + $0x30] sm:$0xff] }
   0x9   :  { %35 = vst.msk [vmem:[#allocation2 + $0x78] sm:$0xff] %vm19_vm0, %v343_v3  ;;  %321 = vmatpush3.bf16.msra.mxu0 %v81_v8  ;;  %341 = vmatpush3.bf16.msra.mxu1 %v81_v8  ;;  %v74_v24 = vpack.c.bf16 %v65_v20, %v64_v19  ;;  %v59_v26 = vld [vmem:[%s550_s0 + $0x38] sm:$0xff]  ;;  %v66_v27 = vld [vmem:[%s550_s0 + $0x70] sm:$0xff]  ;;  %v36_v33 = vld [vmem:[#allocation2] sm:$0xff] }
   0xa   :  { %v67_v28 = vld [vmem:[%s550_s0 + $0x78] sm:$0xff]  ;;  %v71_v29 = vpack.c.bf16 %v59_v26, %v58_v25  ;;  %v38_v31 = vld [vmem:[#allocation2 + $0x10] sm:$0xff]  ;;  %v37_v43 = vld [vmem:[#allocation2 + $0x8] sm:$0xff] }
   0xb   :  { %v75_v30 = vpack.c.bf16 %v67_v28, %v66_v27  ;;  %v39_v37 = vld [vmem:[#allocation2 + $0x18] sm:$0xff]  ;;  %v42_v55 = vld [vmem:[#allocation2 + $0x30] sm:$0xff]  ;;  %v40_v57 = vld [vmem:[#allocation2 + $0x20] sm:$0xff] }
   0xc   :  { %323 = vmatmul.mubr.msk.bf16.vlgmr.msra.gmra.mrb[0].mxu0 %vm82_vm1, %v69_v21  ;;  %331 = vmatmul.mubr.msk.bf16.vlgmr.msra.gmra.mrb[0].mxu1 %vm82_vm1, %v73_v22  ;;  %v44_v34 = vld [vmem:[#allocation2 + $0x40] sm:$0xff]  ;;  %v43_v62 = vld [vmem:[#allocation2 + $0x38] sm:$0xff]  ;;  %v41_v4 = vld [vmem:[#allocation2 + $0x28] sm:$0xff] }
   0xd   :  { %326 = vmatprep.mubr.msk.bf16.mxu0 %vm82_vm1, %v70_v23  ;;  %334 = vmatprep.mubr.msk.bf16.mxu1 %vm82_vm1, %v74_v24  ;;  %v46_v32 = vld [vmem:[#allocation2 + $0x50] sm:$0xff]  ;;  %v45_v44 = vld [vmem:[#allocation2 + $0x48] sm:$0xff]  ;;  %v459_v59 = vld [vmem:[%s551_s2] ss:$0 sm:$0xff] }
   0xe   :  { %v47_v38 = vld [vmem:[#allocation2 + $0x58] sm:$0xff]  ;;  %v48_v58 = vld [vmem:[#allocation2 + $0x60] sm:$0xff] }
   0xf   :  { %v50_v56 = vld [vmem:[#allocation2 + $0x70] sm:$0xff]  ;;  %v49_v5 = vld [vmem:[#allocation2 + $0x68] sm:$0xff] }
  0x10   :  { %v51_v63 = vld [vmem:[#allocation2 + $0x78] sm:$0xff] }
  0x14   :  { %327 = vmatmul.mubr.msk.bf16.gmra.mrb[4].mxu0 %vm82_vm1, %v71_v29  ;;  %335 = vmatmul.mubr.msk.bf16.gmra.mrb[4].mxu1 %vm82_vm1, %v75_v30 }
  0xdf   :  { %v324_v35 = vpop.f32.mrb[0].mxu0  ;;  %v332_v36 = vpop.f32.mrb[0].mxu1 }
  0xe0   :  { %v206_v39 = vadd.f32 %v324_v35, %v38_v31  ;;  %v214_v40 = vadd.f32 %v332_v36, %v46_v32  ;;  %v141_v41 = vpop.f32.mrb[1].mxu0  ;;  %v173_v42 = vpop.f32.mrb[1].mxu1 }
  0xe1   :  { %v204_v45 = vadd.f32 %v141_v41, %v36_v33  ;;  %v212_v46 = vadd.f32 %v173_v42, %v44_v34  ;;  %v325_v47 = vpop.f32.mrb[2].mxu0  ;;  %v333_v48 = vpop.f32.mrb[2].mxu1 }
  0xe2   :  { %223 = vst.msk [vmem:[#allocation2 + $0x10] sm:$0xff] %vm19_vm0, %v206_v39  ;;  %231 = vst.msk [vmem:[#allocation2 + $0x50] sm:$0xff] %vm19_vm0, %v214_v40  ;;  %v207_v49 = vadd.f32 %v325_v47, %v39_v37  ;;  %v215_v50 = vadd.f32 %v333_v48, %v47_v38  ;;  %v144_v51 = vpop.f32.mrb[3].mxu0  ;;  %v176_v52 = vpop.f32.mrb[3].mxu1 }
  0xe3   :  { %221 = vst.msk [vmem:[#allocation2] sm:$0xff] %vm19_vm0, %v204_v45  ;;  %229 = vst.msk [vmem:[#allocation2 + $0x40] sm:$0xff] %vm19_vm0, %v212_v46  ;;  %v205_v53 = vadd.f32 %v144_v51, %v37_v43  ;;  %v213_v54 = vadd.f32 %v176_v52, %v45_v44 }
  0xe4   :  { %224 = vst.msk [vmem:[#allocation2 + $0x18] sm:$0xff] %vm19_vm0, %v207_v49  ;;  %232 = vst.msk [vmem:[#allocation2 + $0x58] sm:$0xff] %vm19_vm0, %v215_v50 }
  0xe5   :  { %222 = vst.msk [vmem:[#allocation2 + $0x8] sm:$0xff] %vm19_vm0, %v205_v53  ;;  %230 = vst.msk [vmem:[#allocation2 + $0x48] sm:$0xff] %vm19_vm0, %v213_v54 }
  0xe7   :  { %v328_v60 = vpop.f32.mrb[4].mxu0  ;;  %v336_v61 = vpop.f32.mrb[4].mxu1 }
  0xe8   :  { %v210_v0 = vadd.f32 %v328_v60, %v42_v55  ;;  %v218_v1 = vadd.f32 %v336_v61, %v50_v56  ;;  %v157_v2 = vpop.f32.mrb[5].mxu0  ;;  %v189_v3 = vpop.f32.mrb[5].mxu1 }
  0xe9   :  { %v242_v6 = vld [vmem:[#allocation2 + $0x10] sm:$0xff]  ;;  %v208_v8 = vadd.f32 %v157_v2, %v40_v57  ;;  %v216_v9 = vadd.f32 %v189_v3, %v48_v58  ;;  %v329_v10 = vpop.f32.mrb[6].mxu0  ;;  %v337_v11 = vpop.f32.mrb[6].mxu1 }
  0xea   :  { %v250_v7 = vld [vmem:[#allocation2 + $0x50] sm:$0xff]  ;;  %v265_v12 = vadd.f32 %v459_v59, %v242_v6  ;;  %v240_v14 = vld [vmem:[#allocation2] sm:$0xff]  ;;  %227 = vst.msk [vmem:[#allocation2 + $0x30] sm:$0xff] %vm19_vm0, %v210_v0  ;;  %235 = vst.msk [vmem:[#allocation2 + $0x70] sm:$0xff] %vm19_vm0, %v218_v1  ;;  %v211_v16 = vadd.f32 %v329_v10, %v43_v62  ;;  %v219_v17 = vadd.f32 %v337_v11, %v51_v63  ;;  %v160_v18 = vpop.f32.mrb[7].mxu0  ;;  %v192_v19 = vpop.f32.mrb[7].mxu1 }
  0xeb   :  { %v273_v13 = vadd.f32 %v459_v59, %v250_v7  ;;  %v248_v15 = vld [vmem:[#allocation2 + $0x40] sm:$0xff]  ;;  %v263_v20 = vadd.f32 %v459_v59, %v240_v14  ;;  %v243_v22 = vld [vmem:[#allocation2 + $0x18] sm:$0xff]  ;;  %225 = vst.msk [vmem:[#allocation2 + $0x20] sm:$0xff] %vm19_vm0, %v208_v8  ;;  %233 = vst.msk [vmem:[#allocation2 + $0x60] sm:$0xff] %vm19_vm0, %v216_v9  ;;  %v209_v24 = vadd.f32 %v160_v18, %v41_v4 }
  0xec   :  { %v271_v21 = vadd.f32 %v459_v59, %v248_v15  ;;  %v251_v23 = vld [vmem:[#allocation2 + $0x58] sm:$0xff]  ;;  %v217_v25 = vadd.f32 %v192_v19, %v49_v5  ;;  %281 = vst.msk [vmem:[%s552_s3 + $0x10] sm:$0xff] %vm19_vm0, %v265_v12  ;;  %v266_v26 = vadd.f32 %v459_v59, %v243_v22  ;;  %v241_v28 = vld [vmem:[#allocation2 + $0x8] sm:$0xff]  ;;  %228 = vst.msk [vmem:[#allocation2 + $0x38] sm:$0xff] %vm19_vm0, %v211_v16 }
  0xed   :  { %289 = vst.msk [vmem:[%s552_s3 + $0x50] sm:$0xff] %vm19_vm0, %v273_v13  ;;  %v274_v27 = vadd.f32 %v459_v59, %v251_v23  ;;  %v249_v29 = vld [vmem:[#allocation2 + $0x48] sm:$0xff]  ;;  %236 = vst.msk [vmem:[#allocation2 + $0x78] sm:$0xff] %vm19_vm0, %v219_v17  ;;  %v264_v30 = vadd.f32 %v459_v59, %v241_v28 }
  0xee   :  { %279 = vst.msk [vmem:[%s552_s3] sm:$0xff] %vm19_vm0, %v263_v20  ;;  %287 = vst.msk [vmem:[%s552_s3 + $0x40] sm:$0xff] %vm19_vm0, %v271_v21  ;;  %v272_v31 = vadd.f32 %v459_v59, %v249_v29 }
  0xef   :  { %226 = vst.msk [vmem:[#allocation2 + $0x28] sm:$0xff] %vm19_vm0, %v209_v24  ;;  %234 = vst.msk [vmem:[#allocation2 + $0x68] sm:$0xff] %vm19_vm0, %v217_v25 }
  0xf0   :  { %282 = vst.msk [vmem:[%s552_s3 + $0x18] sm:$0xff] %vm19_vm0, %v266_v26  ;;  %290 = vst.msk [vmem:[%s552_s3 + $0x58] sm:$0xff] %vm19_vm0, %v274_v27 }
  0xf1   :  { %280 = vst.msk [vmem:[%s552_s3 + $0x8] sm:$0xff] %vm19_vm0, %v264_v30  ;;  %288 = vst.msk [vmem:[%s552_s3 + $0x48] sm:$0xff] %vm19_vm0, %v272_v31  ;;  %v246_v32 = vld [vmem:[#allocation2 + $0x30] sm:$0xff] }
  0xf2   :  { %v254_v33 = vld [vmem:[#allocation2 + $0x70] sm:$0xff]  ;;  %v269_v34 = vadd.f32 %v459_v59, %v246_v32  ;;  %v244_v36 = vld [vmem:[#allocation2 + $0x20] sm:$0xff] }
  0xf3   :  { %v277_v35 = vadd.f32 %v459_v59, %v254_v33  ;;  %v252_v37 = vld [vmem:[#allocation2 + $0x60] sm:$0xff]  ;;  %v267_v38 = vadd.f32 %v459_v59, %v244_v36  ;;  %v247_v40 = vld [vmem:[#allocation2 + $0x38] sm:$0xff] }
  0xf4   :  { %v275_v39 = vadd.f32 %v459_v59, %v252_v37  ;;  %v255_v41 = vld [vmem:[#allocation2 + $0x78] sm:$0xff]  ;;  %285 = vst.msk [vmem:[%s552_s3 + $0x30] sm:$0xff] %vm19_vm0, %v269_v34  ;;  %v270_v42 = vadd.f32 %v459_v59, %v247_v40 }
  0xf5   :  { %293 = vst.msk [vmem:[%s552_s3 + $0x70] sm:$0xff] %vm19_vm0, %v277_v35  ;;  %v278_v43 = vadd.f32 %v459_v59, %v255_v41  ;;  %283 = vst.msk [vmem:[%s552_s3 + $0x20] sm:$0xff] %vm19_vm0, %v267_v38 }
  0xf6   :  { %v245_v44 = vld [vmem:[#allocation2 + $0x28] sm:$0xff]  ;;  %291 = vst.msk [vmem:[%s552_s3 + $0x60] sm:$0xff] %vm19_vm0, %v275_v39  ;;  %286 = vst.msk [vmem:[%s552_s3 + $0x38] sm:$0xff] %vm19_vm0, %v270_v42 }
  0xf7   :  { %v253_v45 = vld [vmem:[#allocation2 + $0x68] sm:$0xff]  ;;  %v268_v46 = vadd.f32 %v459_v59, %v245_v44  ;;  %294 = vst.msk [vmem:[%s552_s3 + $0x78] sm:$0xff] %vm19_vm0, %v278_v43 }
  0xf8   :  { %v276_v47 = vadd.f32 %v459_v59, %v253_v45 }
  0xf9   :  { %284 = vst.msk [vmem:[%s552_s3 + $0x28] sm:$0xff] %vm19_vm0, %v268_v46 }
  0xfa   :  { %292 = vst.msk [vmem:[%s552_s3 + $0x68] sm:$0xff] %vm19_vm0, %v276_v47 }

</bundles_post_ra>
